<compile_context>
chip_gen: v7x
topology: tpu7x:2x2x1
jax: 0.10.0
libtpu: 0.0.40
codegen_flags: <defaults>
</compile_context>

<pallas_src>
import jax
import jax.numpy as jnp
from jax import lax
from jax.experimental import pallas as pl
from jax.experimental.pallas import tpu as pltpu


def _round_up(v, m):
    return ((v + m - 1) // m) * m


def _img_encoder_kernel(pooled_ref, w_patch_ref, b_patch_ref,
                        w_head_ref, b_head_ref, w_proj_ref, b_proj_ref,
                        out_ref):
    # pooled_ref: [TB, Dp_pad] bf16 (patches already mean-pooled in the wrapper).
    # Weights are bf16, zero-padded lane-dense; biases are f32 rows.
    # Three chained bf16 x bf16 matmuls with f32 accumulation.
    pooled = jnp.dot(pooled_ref[...], w_patch_ref[...],
                     preferred_element_type=jnp.float32) + b_patch_ref[...]   # [TB, H_pad]
    h = jnp.dot(pooled.astype(jnp.bfloat16), w_head_ref[...],
                preferred_element_type=jnp.float32) + b_head_ref[...]         # [TB, E_pad]
    y = jnp.dot(h.astype(jnp.bfloat16), w_proj_ref[...],
                preferred_element_type=jnp.float32) + b_proj_ref[...]         # [TB, O_pad]

    # F.normalize(p=2, dim=1): x * rsqrt(max(sum(x^2), eps^2)), all in f32.
    # Padded columns are exactly zero so they do not perturb the norm.
    ss = jnp.sum(y * y, axis=1, keepdims=True)                                # [TB, 1]
    inv = lax.rsqrt(jnp.maximum(ss, 1e-24))       # == 1/max(||y||, 1e-12), EUP slot
    out_ref[...] = (y * inv).astype(out_ref.dtype)


def image_encoder_forward(x, params, *, patch, alpha, rank, block_b=256):
    """x: NCHW float32 image batch. Returns L2-normalized [B, embed_dim] f32."""
    B, C, H, W = x.shape
    Hp, Wp = H // patch, W // patch
    Dp = C * patch * patch

    hidden = params['w_patch'].shape[1]
    enc_dim = params['w_head'].shape[1]
    embed_dim = params['w_proj'].shape[1]

    # ---- exact pre-pool in the wrapper: mean over patches commutes with the
    # linear patch embed.  [B,C,Hp,p,Wp,p] -> mean(Hp,Wp) -> [B, C*p*p] (c,ph,pw
    # ordering matches the reference patchify).  Kernel input shrinks by P x.
    pooled_x = x.reshape(B, C, Hp, patch, Wp, patch).mean(axis=(2, 4))
    pooled_x = pooled_x.reshape(B, Dp)

    # ---- pre-merge the static LoRA delta into the head weight (exact rewrite).
    scale = float(alpha) / float(rank)
    w_head_eff = params['w_head'] + scale * (params['lora_a'] @ params['lora_b'])

    # ---- lane-dense zero padding of every contraction / output dimension.
    dp_pad = _round_up(Dp, 128)
    h_pad = _round_up(hidden, 128)
    e_pad = _round_up(enc_dim, 128)
    o_pad = _round_up(embed_dim, 128)

    pooled_x = jnp.pad(pooled_x, ((0, 0), (0, dp_pad - Dp)))
    w_patch = jnp.pad(params['w_patch'], ((0, dp_pad - Dp), (0, h_pad - hidden)))
    b_patch = jnp.pad(params['b_patch'], ((0, h_pad - hidden),))
    w_head = jnp.pad(w_head_eff, ((0, h_pad - hidden), (0, e_pad - enc_dim)))
    b_head = jnp.pad(params['b_head'], ((0, e_pad - enc_dim),))
    w_proj = jnp.pad(params['w_proj'], ((0, e_pad - enc_dim), (0, o_pad - embed_dim)))
    b_proj = jnp.pad(params['b_proj'], ((0, o_pad - embed_dim),))

    # ---- bf16 streaming data / weights, f32 biases (epilogue math stays f32).
    pooled_x = pooled_x.astype(jnp.bfloat16)
    w_patch = w_patch.astype(jnp.bfloat16)
    w_head = w_head.astype(jnp.bfloat16)
    w_proj = w_proj.astype(jnp.bfloat16)

    # ---- batch tiling: sublane multiple (16 for bf16), and prefer n_b >= 2 so
    # the "parallel" axis can shard across v7x's two TensorCores when B allows.
    tb = min(block_b, max(16, _round_up(pl.cdiv(B, 2), 16)))
    tb = _round_up(tb, 16)
    n_b = pl.cdiv(B, tb)
    b_pad = n_b * tb
    if b_pad != B:
        pooled_x = jnp.pad(pooled_x, ((0, b_pad - B), (0, 0)))

    args = (
        pooled_x,            # [B_pad, Dp_pad]   bf16
        w_patch,             # [Dp_pad, H_pad]   bf16
        b_patch[None, :],    # [1, H_pad]        f32
        w_head,              # [H_pad, E_pad]    bf16  (LoRA merged)
        b_head[None, :],     # [1, E_pad]        f32
        w_proj,              # [E_pad, O_pad]    bf16
        b_proj[None, :],     # [1, O_pad]        f32
    )

    single = pl.Buffered(1)  # grid-invariant -> no double-buffer VMEM waste
    in_specs = [
        pl.BlockSpec((tb, dp_pad), lambda i: (i, 0)),
        pl.BlockSpec((dp_pad, h_pad), lambda i: (0, 0), pipeline_mode=single),
        pl.BlockSpec((1, h_pad), lambda i: (0, 0), pipeline_mode=single),
        pl.BlockSpec((h_pad, e_pad), lambda i: (0, 0), pipeline_mode=single),
        pl.BlockSpec((1, e_pad), lambda i: (0, 0), pipeline_mode=single),
        pl.BlockSpec((e_pad, o_pad), lambda i: (0, 0), pipeline_mode=single),
        pl.BlockSpec((1, o_pad), lambda i: (0, 0), pipeline_mode=single),
    ]
    out_specs = pl.BlockSpec((tb, o_pad), lambda i: (i, 0))

    # ---- VMEM budget derived from the actual buffers (kept well under v7x's
    # 64 MiB; bigger tiles are fine on v5e/v6e's 128 MiB).
    bytes_in = tb * dp_pad * 2
    bytes_w = 2 * (dp_pad * h_pad + h_pad * e_pad + e_pad * o_pad)
    bytes_b = 4 * (h_pad + e_pad + o_pad)
    bytes_out = tb * o_pad * 4
    bytes_interm = tb * (h_pad + e_pad + o_pad) * 4
    vmem_est = 2 * bytes_in + bytes_w + bytes_b + 2 * bytes_out + bytes_interm
    vmem_limit = int(min(56 * 2**20, max(16 * 2**20, 4 * vmem_est)))

    flops = 2 * b_pad * (dp_pad * h_pad + h_pad * e_pad + e_pad * o_pad)
    bytes_accessed = (2 * (b_pad * dp_pad + dp_pad * h_pad + h_pad * e_pad
                           + e_pad * o_pad)
                      + 4 * (h_pad + e_pad + o_pad + b_pad * o_pad))
    cost = pl.CostEstimate(flops=flops, transcendentals=b_pad,
                           bytes_accessed=bytes_accessed)

    out_padded = pl.pallas_call(
        _img_encoder_kernel,
        out_shape=jax.ShapeDtypeStruct((b_pad, o_pad), jnp.float32),
        grid=(n_b,),
        in_specs=in_specs,
        out_specs=out_specs,
        compiler_params=pltpu.CompilerParams(
            dimension_semantics=("parallel",),
            vmem_limit_bytes=vmem_limit,
        ),
        cost_estimate=cost,
    )(*args)

    return out_padded[:B, :embed_dim]


def _reference_forward(x, params, *, patch, alpha, rank):
    """Pure-JAX f32 reference matching the original module's forward semantics."""
    B, C, H, W = x.shape
    Hp, Wp = H // patch, W // patch
    patches = x.reshape(B, C, Hp, patch, Wp, patch)
    patches = patches.transpose(0, 2, 4, 1, 3, 5).reshape(
        B, Hp * Wp, C * patch * patch)
    emb = jnp.einsum('bpd,dh->bph', patches, params['w_patch']) + params['b_patch']
    pooled = jnp.mean(emb, axis=1)
    h = (pooled @ params['w_head'] + params['b_head']
         + (alpha / rank) * ((pooled @ params['lora_a']) @ params['lora_b']))
    y = h @ params['w_proj'] + params['b_proj']
    norm = jnp.sqrt(jnp.sum(y * y, axis=1, keepdims=True))
    return y / jnp.maximum(norm, 1e-12)


if __name__ == "__main__":
    # Small shapes consistent with the module's forward.
    B, C, IMG, PATCH = 2, 3, 16, 8
    HIDDEN = 64                 # synthetic base-encoder width
    ENCODER_DIM = 64            # encoder output dim
    EMBED_DIM = 32              # embed_proj output dim (dim_proj=True)
    RANK, ALPHA = 8, 1.0
    DP = C * PATCH * PATCH

    key = jax.random.PRNGKey(0)
    kx, k1, k2, k3, k4, k5, k6, k7, k8 = jax.random.split(key, 9)

    x = jax.random.normal(kx, (B, C, IMG, IMG), dtype=jnp.float32)

    params = {
        'w_patch': 0.02 * jax.random.normal(k1, (DP, HIDDEN), jnp.float32),
        'b_patch': 0.01 * jax.random.normal(k2, (HIDDEN,), jnp.float32),
        'w_head':  0.02 * jax.random.normal(k3, (HIDDEN, ENCODER_DIM), jnp.float32),
        'b_head':  0.01 * jax.random.normal(k4, (ENCODER_DIM,), jnp.float32),
        'lora_a':  0.10 * jax.random.normal(k5, (HIDDEN, RANK), jnp.float32),
        'lora_b':  0.10 * jax.random.normal(k6, (RANK, ENCODER_DIM), jnp.float32),
        'w_proj':  0.02 * jax.random.normal(k7, (ENCODER_DIM, EMBED_DIM), jnp.float32),
        'b_proj':  0.01 * jax.random.normal(k8, (EMBED_DIM,), jnp.float32),
    }

    out = image_encoder_forward(x, params, patch=PATCH, alpha=ALPHA, rank=RANK)
    out = jax.block_until_ready(out)

    ref = _reference_forward(x, params, patch=PATCH, alpha=ALPHA, rank=RANK)
    assert out.shape == (B, EMBED_DIM)
    # bf16 streaming data/weights (f32 accumulate) -> loosened tolerance vs f32 ref.
    assert jnp.allclose(out, ref, atol=2e-2, rtol=2e-2), "mismatch vs reference"
    # rows should be unit-norm (normalization runs in f32 inside the kernel)
    assert jnp.allclose(jnp.linalg.norm(out, axis=1), 1.0, atol=1e-3)

    print("KERNEL_OK")
</pallas_src>

<mosaic_0001>
module attributes {stable_mosaic.version = 11 : i64} {
  func.func @_img_encoder_kernel(%arg0: i32, %arg1: memref<16x256xbf16, #tpu.memory_space<vmem>>, %arg2: memref<256x128xbf16, #tpu.memory_space<vmem>>, %arg3: memref<1x128xf32, #tpu.memory_space<vmem>>, %arg4: memref<128x128xbf16, #tpu.memory_space<vmem>>, %arg5: memref<1x128xf32, #tpu.memory_space<vmem>>, %arg6: memref<128x128xbf16, #tpu.memory_space<vmem>>, %arg7: memref<1x128xf32, #tpu.memory_space<vmem>>, %arg8: memref<16x128xf32, #tpu.memory_space<vmem>>) attributes {dimension_semantics = [#tpu.dimension_semantics<parallel>], iteration_bounds = array<i64: 1>, scalar_prefetch = 0 : i64, scratch_operands = 0 : i64, tpu.core_type = #tpu.core_type<tc>, window_params = [{transform_indices = @transform_0, window_bounds = array<i64: 16, 256>}, {pipeline_mode = #tpu.pipeline_mode<synchronous>, transform_indices = @transform_1, window_bounds = array<i64: 256, 128>}, {pipeline_mode = #tpu.pipeline_mode<synchronous>, transform_indices = @transform_2, window_bounds = array<i64: 1, 128>}, {pipeline_mode = #tpu.pipeline_mode<synchronous>, transform_indices = @transform_3, window_bounds = array<i64: 128, 128>}, {pipeline_mode = #tpu.pipeline_mode<synchronous>, transform_indices = @transform_4, window_bounds = array<i64: 1, 128>}, {pipeline_mode = #tpu.pipeline_mode<synchronous>, transform_indices = @transform_5, window_bounds = array<i64: 128, 128>}, {pipeline_mode = #tpu.pipeline_mode<synchronous>, transform_indices = @transform_6, window_bounds = array<i64: 1, 128>}, {transform_indices = @transform_7, window_bounds = array<i64: 16, 128>}]} {
    %c0 = arith.constant 0 : index
    %c0_0 = arith.constant 0 : index
    %0 = vector.load %arg1[%c0, %c0_0] : memref<16x256xbf16, #tpu.memory_space<vmem>>, vector<16x256xbf16>
    %c0_1 = arith.constant 0 : index
    %c0_2 = arith.constant 0 : index
    %1 = vector.load %arg2[%c0_1, %c0_2] : memref<256x128xbf16, #tpu.memory_space<vmem>>, vector<256x128xbf16>
    %cst = arith.constant dense<0.000000e+00> : vector<16x128xf32>
    %2 = tpu.matmul %0, %1, %cst {dimension_numbers = #tpu.dot_dimension_numbers<[1], [0], [0], [1], [0, 0, 1, 1], [], []>} : vector<16x256xbf16>, vector<256x128xbf16>, vector<16x128xf32> -> vector<16x128xf32>
    %c0_3 = arith.constant 0 : index
    %c0_4 = arith.constant 0 : index
    %3 = vector.load %arg3[%c0_3, %c0_4] : memref<1x128xf32, #tpu.memory_space<vmem>>, vector<1x128xf32>
    %4 = vector.broadcast %3 : vector<1x128xf32> to vector<16x128xf32>
    %5 = arith.addf %2, %4 : vector<16x128xf32>
    %6 = arith.truncf %5 : vector<16x128xf32> to vector<16x128xbf16>
    %c0_5 = arith.constant 0 : index
    %c0_6 = arith.constant 0 : index
    %7 = vector.load %arg4[%c0_5, %c0_6] : memref<128x128xbf16, #tpu.memory_space<vmem>>, vector<128x128xbf16>
    %cst_7 = arith.constant dense<0.000000e+00> : vector<16x128xf32>
    %8 = tpu.matmul %6, %7, %cst_7 {dimension_numbers = #tpu.dot_dimension_numbers<[1], [0], [0], [1], [0, 0, 1, 1], [], []>} : vector<16x128xbf16>, vector<128x128xbf16>, vector<16x128xf32> -> vector<16x128xf32>
    %c0_8 = arith.constant 0 : index
    %c0_9 = arith.constant 0 : index
    %9 = vector.load %arg5[%c0_8, %c0_9] : memref<1x128xf32, #tpu.memory_space<vmem>>, vector<1x128xf32>
    %10 = vector.broadcast %9 : vector<1x128xf32> to vector<16x128xf32>
    %11 = arith.addf %8, %10 : vector<16x128xf32>
    %12 = arith.truncf %11 : vector<16x128xf32> to vector<16x128xbf16>
    %c0_10 = arith.constant 0 : index
    %c0_11 = arith.constant 0 : index
    %13 = vector.load %arg6[%c0_10, %c0_11] : memref<128x128xbf16, #tpu.memory_space<vmem>>, vector<128x128xbf16>
    %cst_12 = arith.constant dense<0.000000e+00> : vector<16x128xf32>
    %14 = tpu.matmul %12, %13, %cst_12 {dimension_numbers = #tpu.dot_dimension_numbers<[1], [0], [0], [1], [0, 0, 1, 1], [], []>} : vector<16x128xbf16>, vector<128x128xbf16>, vector<16x128xf32> -> vector<16x128xf32>
    %c0_13 = arith.constant 0 : index
    %c0_14 = arith.constant 0 : index
    %15 = vector.load %arg7[%c0_13, %c0_14] : memref<1x128xf32, #tpu.memory_space<vmem>>, vector<1x128xf32>
    %16 = vector.broadcast %15 : vector<1x128xf32> to vector<16x128xf32>
    %17 = arith.addf %14, %16 : vector<16x128xf32>
    %18 = arith.mulf %17, %17 : vector<16x128xf32>
    %cst_15 = arith.constant dense<0.000000e+00> : vector<16xf32>
    %19 = vector.multi_reduction <add>, %18, %cst_15 [1] : vector<16x128xf32> to vector<16xf32>
    %20 = vector.shape_cast %19 : vector<16xf32> to vector<16x1xf32>
    %cst_16 = arith.constant 1.000000e-24 : f32
    %21 = vector.broadcast %cst_16 : f32 to vector<16x1xf32>
    %22 = arith.maximumf %20, %21 : vector<16x1xf32>
    %23 = math.rsqrt %22 : vector<16x1xf32>
    %24 = vector.broadcast %23 : vector<16x1xf32> to vector<16x128xf32>
    %25 = arith.mulf %17, %24 : vector<16x128xf32>
    %c0_17 = arith.constant 0 : index
    %c0_18 = arith.constant 0 : index
    %26 = vector.load %arg8[%c0_17, %c0_18] : memref<16x128xf32, #tpu.memory_space<vmem>>, vector<16x128xf32>
    tpu.vector_store %arg8[%c0_17, %c0_18], %25 {strides = array<i32>} : memref<16x128xf32, #tpu.memory_space<vmem>>, vector<16x128xf32>,
    return
  }
  func.func @transform_0(%arg0: i32) -> (i32, i32) {
    %c0_i32 = arith.constant 0 : i32
    %c0_i32_0 = arith.constant 0 : i32
    return %arg0, %c0_i32 : i32, i32
  }
  func.func @transform_1(%arg0: i32) -> (i32, i32) {
    %c0_i32 = arith.constant 0 : i32
    %c0_i32_0 = arith.constant 0 : i32
    %c0_i32_1 = arith.constant 0 : i32
    return %c0_i32, %c0_i32_0 : i32, i32
  }
  func.func @transform_2(%arg0: i32) -> (i32, i32) {
    %c0_i32 = arith.constant 0 : i32
    %c0_i32_0 = arith.constant 0 : i32
    %c0_i32_1 = arith.constant 0 : i32
    return %c0_i32, %c0_i32_0 : i32, i32
  }
  func.func @transform_3(%arg0: i32) -> (i32, i32) {
    %c0_i32 = arith.constant 0 : i32
    %c0_i32_0 = arith.constant 0 : i32
    %c0_i32_1 = arith.constant 0 : i32
    return %c0_i32, %c0_i32_0 : i32, i32
  }
  func.func @transform_4(%arg0: i32) -> (i32, i32) {
    %c0_i32 = arith.constant 0 : i32
    %c0_i32_0 = arith.constant 0 : i32
    %c0_i32_1 = arith.constant 0 : i32
    return %c0_i32, %c0_i32_0 : i32, i32
  }
  func.func @transform_5(%arg0: i32) -> (i32, i32) {
    %c0_i32 = arith.constant 0 : i32
    %c0_i32_0 = arith.constant 0 : i32
    %c0_i32_1 = arith.constant 0 : i32
    return %c0_i32, %c0_i32_0 : i32, i32
  }
  func.func @transform_6(%arg0: i32) -> (i32, i32) {
    %c0_i32 = arith.constant 0 : i32
    %c0_i32_0 = arith.constant 0 : i32
    %c0_i32_1 = arith.constant 0 : i32
    return %c0_i32, %c0_i32_0 : i32, i32
  }
  func.func @transform_7(%arg0: i32) -> (i32, i32) {
    %c0_i32 = arith.constant 0 : i32
    %c0_i32_0 = arith.constant 0 : i32
    return %arg0, %c0_i32 : i32, i32
  }
}

</mosaic_0001>

<bundles_post_ra>
// kernel: tpu_custom_call.1
= control target key start
LH: loop header
LB: loop body
LE: loop exit
PB: predicated region body
PF: predicated region fallthrough
CT: control target
= control target key end

     0   :  { %12 = vsyncpa [#allocation3], 0  ;;  %s975_s0 = inlined_call_operand.hbm [shape: bf16[16,256], index: 0, kind: input, shape index: {}]   ;;  %s976_s1 = inlined_call_operand.hbm [shape: bf16[256,128], index: 1, kind: input, shape index: {}]   ;;  %s977_s2 = inlined_call_operand.vmem [shape: f32[1,128], index: 2, kind: input, shape index: {}]   ;;  %s978_s3 = inlined_call_operand.hbm [shape: bf16[128,128], index: 3, kind: input, shape index: {}]   ;;  %s979_s4 = inlined_call_operand.vmem [shape: f32[1,128], index: 4, kind: input, shape index: {}]   ;;  %s980_s5 = inlined_call_operand.hbm [shape: bf16[128,128], index: 5, kind: input, shape index: {}]   ;;  %s981_s6 = inlined_call_operand.vmem [shape: f32[1,128], index: 6, kind: input, shape index: {}]   ;;  %s982_s7 = inlined_call_operand.hbm [shape: f32[16,128], index: 7, kind: output, shape index: {}]  }
   0x1   :  { %13 = vsyncpa [#allocation6], 0 }
   0x2   :  { %14 = vsyncpa [#allocation9], 0 }
   0x3   :  { %15 = vsyncpa [#allocation4], 0  ;;  %s815_s24 = smov [#allocation5]   ;;  %s697_s28 = scalar_lea.hbm %s976_s1, 2048 }
   0x4   :  { %s33_s25 = sshll.u32 %s815_s24, 4  ;;  %p698_p0 = scmp.ne.s32.totalorder %s976_s1, %s697_s28  ;;  %s34_s25 = int_to_ptr.vmem [resolvable:$true] %s33_s25 }
   0x5   :  { %p701_p1 = scmp.lt.u32.totalorder %s697_s28, %s976_s1 }
   0x7   :  { %p703_p2 = pnand %p701_p1, %p698_p0 }
   0x9   :  { %706 = shalt.err (!%p703_p2)
}
   0xa   :  { %s707_s10 = scalar_lea.vmem %s34_s25, 2048  ;;  %p712_p4 = scmp.lt.s32.totalorder %s34_s25, %s34_s25 }
   0xb   :  { %p708_p3 = scmp.ne.s32.totalorder %s34_s25, %s707_s10  ;;  %p713_p5 = scmp.lt.s32.totalorder %s707_s10, %s707_s10 }
   0xd   :  { %p714_p6 = por %p713_p5, %p712_p4 }
   0xf   :  { %p715_p7 = pnand %p714_p6, %p708_p3 }
  0x11   :  { %718 = shalt.err (!%p715_p7)
}
  0x12   :  { %s816_s11 = smov 64   ;;  %s817_s12 = smov 4  }
  0x13   :  { %39 = dma.hbm_to_vmem [thread:$0]  %s976_s1, 2048, %s34_s25, [#allocation6], %s816_s11, %s816_s11, %s817_s12  }
  0x14   :  { %s818_s15 = smov [#allocation2]   ;;  %s719_s19 = scalar_lea.hbm %s975_s0, 256 }
  0x15   :  { %s21_s16 = sshll.u32 %s818_s15, 4  ;;  %p720_p8 = scmp.ne.s32.totalorder %s975_s0, %s719_s19  ;;  %s22_s16 = int_to_ptr.vmem [resolvable:$true] %s21_s16 }
  0x16   :  { %p723_p9 = scmp.lt.u32.totalorder %s719_s19, %s975_s0 }
  0x18   :  { %p725_p10 = pnand %p723_p9, %p720_p8 }
  0x1a   :  { %728 = shalt.err (!%p725_p10)
}
  0x1b   :  { %s729_s24 = scalar_lea.vmem %s22_s16, 256  ;;  %p734_p12 = scmp.lt.s32.totalorder %s22_s16, %s22_s16 }
  0x1c   :  { %p730_p11 = scmp.ne.s32.totalorder %s22_s16, %s729_s24  ;;  %p735_p13 = scmp.lt.s32.totalorder %s729_s24, %s729_s24 }
  0x1e   :  { %p736_p0 = por %p735_p13, %p734_p12 }
  0x20   :  { %p737_p1 = pnand %p736_p0, %p730_p11 }
  0x22   :  { %740 = shalt.err (!%p737_p1)
}
  0x23   :  { %s819_s1 = smov 128   ;;  %s820_s25 = smov 8  }
  0x24   :  { %27 = dma.hbm_to_vmem [thread:$0]  %s975_s0, 256, %s22_s16, [#allocation3], %s819_s1, %s819_s1, %s820_s25  }
  0x25   :  { %s821_s28 = smov [#allocation7]   ;;  %s822_s30 = smov [#allocation8]  }
  0x26   :  { %s47_s29 = sshll.u32 %s821_s28, 4  ;;  %s61_s8 = sshll.u32 %s822_s30, 4  ;;  %s48_s29 = int_to_ptr.vmem [resolvable:$true] %s47_s29  ;;  %s896_s8 = int_to_ptr.vmem [resolvable:$true] %s61_s8 }
  0x27   :  { %s741_s13 = scalar_lea.hbm %s978_s3, 1024 }
  0x28   :  { %p742_p2 = scmp.ne.s32.totalorder %s978_s3, %s741_s13  ;;  %p745_p3 = scmp.lt.u32.totalorder %s741_s13, %s978_s3 }
  0x2a   :  { %p747_p4 = pnand %p745_p3, %p742_p2 }
  0x2c   :  { %750 = shalt.err (!%p747_p4)
}
  0x2d   :  { %s751_s0 = scalar_lea.vmem %s48_s29, 1024  ;;  %p756_p6 = scmp.lt.s32.totalorder %s48_s29, %s48_s29 }
  0x2e   :  { %p752_p5 = scmp.ne.s32.totalorder %s48_s29, %s751_s0  ;;  %p757_p7 = scmp.lt.s32.totalorder %s751_s0, %s751_s0 }
  0x30   :  { %p758_p8 = por %p757_p7, %p756_p6 }
  0x32   :  { %p759_p9 = pnand %p758_p8, %p752_p5 }
  0x34   :  { %762 = shalt.err (!%p759_p9)
}
  0x35   :  { %53 = dma.hbm_to_vmem [thread:$0]  %s978_s3, 1024, %s48_s29, [#allocation6], %s816_s11, %s816_s11, %s817_s12  }
  0x36   :  { %s763_s22 = scalar_lea.hbm %s980_s5, 1024 }
  0x37   :  { %p764_p10 = scmp.ne.s32.totalorder %s980_s5, %s763_s22  ;;  %p767_p11 = scmp.lt.u32.totalorder %s763_s22, %s980_s5 }
  0x39   :  { %p769_p12 = pnand %p767_p11, %p764_p10 }
  0x3b   :  { %772 = shalt.err (!%p769_p12)
}
  0x3c   :  { %s773_s28 = scalar_lea.vmem %s896_s8, 1024  ;;  %p778_p0 = scmp.lt.s32.totalorder %s896_s8, %s896_s8 }
  0x3d   :  { %p774_p13 = scmp.ne.s32.totalorder %s896_s8, %s773_s28  ;;  %p779_p1 = scmp.lt.s32.totalorder %s773_s28, %s773_s28 }
  0x3f   :  { %p780_p2 = por %p779_p1, %p778_p0 }
  0x41   :  { %p781_p3 = pnand %p780_p2, %p774_p13 }
  0x43   :  { %784 = shalt.err (!%p781_p3)
}
  0x44   :  { %67 = dma.hbm_to_vmem [thread:$0]  %s980_s5, 1024, %s896_s8, [#allocation9], %s816_s11, %s816_s11, %s817_s12  }
  0x45   :  { %807 = dma.done.wait [#allocation3], 256  }
  0x46   :  { %808 = vsyncadd [#allocation3], 4294967040 }
  0x47   :  { %809 = dma.done.wait [#allocation6], 3072  }
  0x48   :  { %810 = vsyncadd [#allocation6], 4294964224 }
  0x49   :  { %811 = dma.done.wait [#allocation9], 1024  }
  0x4a   :  { %812 = vsyncadd [#allocation9], 4294966272  ;;  %v823_v0 = vmov 0.0   ;;  %v658_v1 = vld [vmem:[#allocation5 + $0x40] sm:$0xff]   ;;  %v660_v3 = vld [vmem:[#allocation5 + $0x48] sm:$0xff]   ;;  %vm824_vm0 = vmmov 0  }
  0x4b   :  { %607 = vmatprep.subr.bf16.mxu1 %v823_v0  ;;  %v659_v2 = vld [vmem:[#allocation5] sm:$0xff]   ;;  %567 = vmatprep.subr.bf16.mxu0 %v658_v1  ;;  %v661_v4 = vld [vmem:[#allocation5 + $0x8] sm:$0xff]   ;;  %v662_v5 = vld [vmem:[#allocation5 + $0x50] sm:$0xff]  }
  0x4c   :  { %568 = vmatpush3.bf16.msra.mxu0 %v659_v2  ;;  %v663_v6 = vld [vmem:[#allocation5 + $0x10] sm:$0xff]   ;;  %v664_v7 = vld [vmem:[#allocation5 + $0x58] sm:$0xff]   ;;  %v666_v9 = vld [vmem:[#allocation5 + $0x60] sm:$0xff]   ;;  %623 = vmatprep.mubr.msk.bf16.mxu1 %vm824_vm0, %v823_v0 }
  0x4d   :  { %569 = vmatprep.subr.bf16.mxu0 %v660_v3  ;;  %v665_v8 = vld [vmem:[#allocation5 + $0x18] sm:$0xff]   ;;  %v667_v10 = vld [vmem:[#allocation5 + $0x20] sm:$0xff]   ;;  %v668_v11 = vld [vmem:[#allocation5 + $0x68] sm:$0xff]  }
  0x4e   :  { %v669_v12 = vld [vmem:[#allocation5 + $0x28] sm:$0xff]   ;;  %v676_v13 = vld [vmem:[#allocation2 + $0x4] ss:$8 sps:$4 sm:$0xff]   ;;  %v677_v14 = vld [vmem:[#allocation7] sm:$0xff]  }
  0x4f   :  { %v670_v15 = vld [vmem:[#allocation5 + $0x70] sm:$0xff]   ;;  %262 = vmatprep.mubr.bf16.mxu0 %v676_v13  ;;  %608 = vmatpush3.bf16.msra.mxu1 %v677_v14  ;;  %v678_v16 = vld [vmem:[#allocation7 + $0x8] sm:$0xff]   ;;  %v672_v18 = vld [vmem:[#allocation5 + $0x78] sm:$0xff]  }
  0x50   :  { %570 = vmatpush3.bf16.msra.mxu0 %v661_v4  ;;  %v671_v17 = vld [vmem:[#allocation5 + $0x30] sm:$0xff]   ;;  %609 = vmatprep.subr.bf16.mxu1 %v823_v0  ;;  %v673_v20 = vld [vmem:[#allocation5 + $0x38] sm:$0xff]   ;;  %v681_v23 = vld [vmem:[#allocation7 + $0x20] sm:$0xff]  }
  0x51   :  { %571 = vmatprep.subr.bf16.mxu0 %v662_v5  ;;  %v679_v19 = vld [vmem:[#allocation7 + $0x10] sm:$0xff]   ;;  %v680_v21 = vld [vmem:[#allocation7 + $0x18] sm:$0xff]   ;;  %v682_v24 = vld [vmem:[#allocation7 + $0x28] sm:$0xff]  }
  0x52   :  { %v674_v22 = vld [vmem:[#allocation2] ss:$8 sps:$4 sm:$0xff]   ;;  %v685_v27 = vld [vmem:[#allocation8] sm:$0xff]   ;;  %v686_v28 = vld [vmem:[#allocation8 + $0x8] sm:$0xff]  }
  0x53   :  { %610 = vmatpush3.bf16.msra.mxu1 %v678_v16  ;;  %v683_v25 = vld [vmem:[#allocation7 + $0x30] sm:$0xff]   ;;  %v684_v26 = vld [vmem:[#allocation7 + $0x38] sm:$0xff]   ;;  %v689_v31 = vld [vmem:[#allocation8 + $0x20] sm:$0xff]  }
  0x54   :  { %572 = vmatpush3.bf16.msra.mxu0 %v663_v6  ;;  %611 = vmatprep.subr.bf16.mxu1 %v823_v0  ;;  %v687_v29 = vld [vmem:[#allocation8 + $0x10] sm:$0xff]   ;;  %v688_v30 = vld [vmem:[#allocation8 + $0x18] sm:$0xff]   ;;  %v690_v32 = vld [vmem:[#allocation8 + $0x28] sm:$0xff]  }
  0x55   :  { %573 = vmatprep.subr.bf16.mxu0 %v664_v7  ;;  %v530_v37 = vld [vmem:[%s977_s2] ss:$0 sm:$0xff]  ;;  %v692_v44 = vld [vmem:[#allocation8 + $0x38] sm:$0xff]  }
  0x56   :  { %v691_v43 = vld [vmem:[#allocation8 + $0x30] sm:$0xff]  }
  0x57   :  { %612 = vmatpush3.bf16.msra.mxu1 %v679_v19  ;;  %v549_v45 = vld [vmem:[%s979_s4] ss:$0 sm:$0xff]  ;;  %s825_s4 = smov [#allocation10]  }
  0x58   :  { %574 = vmatpush3.bf16.msra.mxu0 %v665_v8  ;;  %613 = vmatprep.subr.bf16.mxu1 %v823_v0  ;;  %v558_v53 = vld [vmem:[%s981_s6] ss:$0 sm:$0xff]  ;;  %s516_s6 = sshll.u32 %s825_s4, 4  ;;  %s517_s6 = int_to_ptr.vmem [resolvable:$true] %s516_s6 }
  0x59   :  { %575 = vmatprep.subr.bf16.mxu0 %v666_v9  ;;  %s785_s9 = scalar_lea.vmem %s517_s6, 256  ;;  %p790_p5 = scmp.lt.s32.totalorder %s517_s6, %s517_s6 }
  0x5a   :  { %p786_p4 = scmp.ne.s32.totalorder %s517_s6, %s785_s9  ;;  %p791_p6 = scmp.lt.s32.totalorder %s785_s9, %s785_s9 }
  0x5b   :  { %614 = vmatpush3.bf16.msra.mxu1 %v680_v21 }
  0x5c   :  { %576 = vmatpush3.bf16.msra.mxu0 %v667_v10  ;;  %615 = vmatprep.subr.bf16.mxu1 %v823_v0  ;;  %p792_p7 = por %p791_p6, %p790_p5 }
  0x5d   :  { %577 = vmatprep.subr.bf16.mxu0 %v668_v11 }
  0x5e   :  { %p793_p8 = pnand %p792_p7, %p786_p4 }
  0x5f   :  { %616 = vmatpush3.bf16.msra.mxu1 %v681_v23 }
  0x60   :  { %578 = vmatpush3.bf16.msra.mxu0 %v669_v12  ;;  %617 = vmatprep.subr.bf16.mxu1 %v823_v0 }
  0x61   :  { %579 = vmatprep.subr.bf16.mxu0 %v670_v15 }
  0x63   :  { %618 = vmatpush3.bf16.msra.mxu1 %v682_v24 }
  0x64   :  { %580 = vmatpush3.bf16.msra.mxu0 %v671_v17  ;;  %619 = vmatprep.subr.bf16.mxu1 %v823_v0 }
  0x65   :  { %581 = vmatprep.subr.bf16.mxu0 %v672_v18 }
  0x67   :  { %620 = vmatpush3.bf16.msra.mxu1 %v683_v25 }
  0x68   :  { %582 = vmatpush3.bf16.msra.mxu0 %v673_v20  ;;  %621 = vmatprep.subr.bf16.mxu1 %v823_v0 }
  0x69   :  { %627 = vmatprep.subr.bf16.mxu0 %v823_v0 }
  0x6b   :  { %263 = vmatmul.mubr.bf16.vlgmr.msra.gmra.mrb[0].mxu0 %v674_v22  ;;  %622 = vmatpush3.bf16.msra.mxu1 %v684_v26 }
  0x6c   :  { %643 = vmatprep.mubr.msk.bf16.mxu0 %vm824_vm0, %v823_v0  ;;  %628 = vmatpush3.bf16.msra.mxu0 %v685_v27 }
  0x6d   :  { %629 = vmatprep.subr.bf16.mxu0 %v823_v0 }
  0x70   :  { %630 = vmatpush3.bf16.msra.mxu0 %v686_v28 }
  0x71   :  { %631 = vmatprep.subr.bf16.mxu0 %v823_v0 }
  0x74   :  { %632 = vmatpush3.bf16.msra.mxu0 %v687_v29 }
  0x75   :  { %633 = vmatprep.subr.bf16.mxu0 %v823_v0 }
  0x78   :  { %634 = vmatpush3.bf16.msra.mxu0 %v688_v30 }
  0x79   :  { %635 = vmatprep.subr.bf16.mxu0 %v823_v0 }
  0x7c   :  { %636 = vmatpush3.bf16.msra.mxu0 %v689_v31 }
  0x7d   :  { %637 = vmatprep.subr.bf16.mxu0 %v823_v0 }
  0x80   :  { %638 = vmatpush3.bf16.msra.mxu0 %v690_v32 }
  0x81   :  { %639 = vmatprep.subr.bf16.mxu0 %v823_v0 }
  0x84   :  { %640 = vmatpush3.bf16.msra.mxu0 %v691_v43 }
  0x85   :  { %641 = vmatprep.subr.bf16.mxu0 %v823_v0 }
  0x88   :  { %642 = vmatpush3.bf16.msra.mxu0 %v692_v44 }
 0x13e   :  { %v583_v33 = vpop.f32.mrb[0].mxu0 }
 0x13f   :  { %v584_v34 = vpop.f32.mrb[1].mxu0 }
 0x140   :  { %v585_v35 = vadd.f32 %v584_v34, %v583_v33  ;;  %v586_v36 = vpop.f32.mrb[2].mxu0 }
 0x141   :  { %v587_v38 = vpop.f32.mrb[3].mxu0 }
 0x142   :  { %v588_v39 = vadd.f32 %v587_v38, %v586_v36  ;;  %v265_v40 = vadd.f32 %v585_v35, %v530_v37 }
 0x144   :  { %v268_v41 = vadd.f32 %v588_v39, %v530_v37 }
 0x146   :  { %v271_v42 = vpack.c.bf16 %v268_v41, %v265_v40 }
 0x148   :  { %624 = vmatmul.mubr.bf16.vlgmr.msra.gmra.mrb[0].mxu1 %v271_v42 }
 0x21b   :  { %v377_v46 = vpop.f32.mrb[0].mxu1 }
 0x21c   :  { %v625_v47 = vpop.f32.mrb[1].mxu1  ;;  %v378_v49 = vadd.f32 %v549_v45, %v377_v46 }
 0x21d   :  { %v380_v48 = vpop.f32.mrb[2].mxu1 }
 0x21e   :  { %v381_v50 = vadd.f32 %v549_v45, %v380_v48  ;;  %v626_v51 = vpop.f32.mrb[3].mxu1 }
 0x220   :  { %v384_v52 = vpack.c.bf16 %v381_v50, %v378_v49 }
 0x222   :  { %644 = vmatmul.mubr.bf16.vlgmr.msra.gmra.mrb[4].mxu0 %v384_v52 }
 0x2f5   :  { %v490_v54 = vpop.f32.mrb[4].mxu0 }
 0x2f6   :  { %v491_v55 = vadd.f32 %v558_v53, %v490_v54  ;;  %v645_v56 = vpop.f32.mrb[5].mxu0 }
 0x2f7   :  { %v493_v57 = vpop.f32.mrb[6].mxu0 }
 0x2f8   :  { %v494_v58 = vadd.f32 %v558_v53, %v493_v57  ;;  %v646_v59 = vpop.f32.mrb[7].mxu0  ;;  %v497_v60 = vmul.f32 %v491_v55, %v491_v55 }
 0x2fa   :  { %499 = vadd.xlane.f32.xlu0 %v497_v60  ;;  %v498_v61 = vmul.f32 %v494_v58, %v494_v58 }
 0x2fe   :  { %501 = vadd.xlane.f32.xlu0 %v498_v61 }
 0x387   :  { %v500_v62 = vpop.xlane.xlu0 %499 }
 0x388   :  { %v503_v63 = vmax.f32 %v500_v62, 1e-24 }
 0x38a   :  { %693 = vrsqrt.f32 %v503_v63 }
 0x38b   :  { %v502_v0 = vpop.xlane.xlu0 %501 }
 0x38c   :  { %v504_v1 = vmax.f32 %v502_v0, 1e-24 }
 0x38e   :  { %695 = vrsqrt.f32 %v504_v1 }
 0x394   :  { %v694_v2 = vpop.eup %693 }
 0x395   :  { %v507_v3 = vmul.f32 %v694_v2, %v491_v55 }
 0x397   :  { %509 = vst [vmem:[#allocation10] sm:$0xff] %v507_v3 }
 0x398   :  { %v696_v4 = vpop.eup %695 }
 0x399   :  { %v508_v5 = vmul.f32 %v696_v4, %v494_v58 }
 0x39b   :  { %510 = vst [vmem:[#allocation10 + $0x8] sm:$0xff] %v508_v5 }
 0x39c   :  { %796 = shalt.err (!%p793_p8)
}
 0x39d   :  { %s797_s14 = scalar_lea.hbm %s982_s7, 256 }
 0x39e   :  { %p798_p9 = scmp.ne.s32.totalorder %s982_s7, %s797_s14  ;;  %p801_p10 = scmp.lt.u32.totalorder %s797_s14, %s982_s7 }
 0x3a0   :  { %p803_p11 = pnand %p801_p10, %p798_p9 }
 0x3a2   :  { %806 = shalt.err (!%p803_p11)
}
 0x3a3   :  { %522 = dma.vmem_to_hbm [thread:$0]  %s517_s6, 256, %s982_s7, [#allocation4], %s819_s1, %s819_s1, %s820_s25  }
 0x3a4   :  { %813 = dma.done.wait [#allocation4], 256  }
 0x3a5   :  { %814 = vsyncadd [#allocation4], 4294967040 }
 0x3a6   :  { %526 = vsyncpa [#allocation3], 1 }
 0x3a7   :  { %527 = vsyncpa [#allocation6], 1 }
 0x3a8   :  { %528 = vsyncpa [#allocation9], 1 }
 0x3a9   :  { %529 = vsyncpa [#allocation4], 1 }

</bundles_post_ra>
